<compile_context>
chip_gen: v5e
topology: v5e:2x2
jax: 0.10.0
libtpu: 0.0.40
codegen_flags: <defaults>
</compile_context>

<pallas_src>
import jax
import jax.numpy as jnp
from jax.experimental import pallas as pl
from jax.experimental.pallas import tpu as pltpu

IN_DIM = 512
HID_DIM = 128
OUT_DIM = 1


def discriminator_kernel(x_ref, w1_ref, b1_ref, w2_ref, b2_ref, o_ref):
    # fc1 on the MXU: bf16 operands, f32 accumulation.
    h = jnp.dot(x_ref[...], w1_ref[...], preferred_element_type=jnp.float32)
    # Bias + LeakyReLU(0.2) in f32 on the VPU (cheap; avoids bf16 VPU math on v5e).
    h = h + b1_ref[...]
    h = jnp.where(h > 0, h, 0.2 * h)
    # fc2 has N=1: a (TB,128)@(128,1) matmul would use 1/128..1/256 of the MXU, so do
    # it as a VPU multiply + XLU lane reduction with w2 as a (1,128) row vector.
    out = jnp.sum(h * w2_ref[...], axis=-1, keepdims=True)
    # OUT_DIM=1 -> masked partial store; output bytes are tiny so this is fine.
    o_ref[...] = out + b2_ref[...]


def discriminator_forward(x, w1, b1, w2, b2, *, tb=512):
    """x: (B, 512) f32. w1: (512, 128), b1: (1, 128), w2: (1, 128), b2: (1, 1)."""
    B = x.shape[0]
    # Batch tile: large enough to hide DMA latency at realistic batch sizes, but do
    # not over-tile tiny batches. Keep it a multiple of 8 (sublane granularity).
    tb = int(min(tb, max(8, ((B + 7) // 8) * 8)))
    n_tiles = pl.cdiv(B, tb)
    b_pad = n_tiles * tb
    if b_pad != B:
        x = jnp.pad(x, ((0, b_pad - B), (0, 0)))

    # Stream x / w1 as bf16 from HBM; accumulation and elementwise math stay f32.
    x_bf16 = x.astype(jnp.bfloat16)
    w1_bf16 = w1.astype(jnp.bfloat16)

    out = pl.pallas_call(
        discriminator_kernel,
        out_shape=jax.ShapeDtypeStruct((b_pad, OUT_DIM), jnp.float32),
        grid=(n_tiles,),
        in_specs=[
            pl.BlockSpec((tb, IN_DIM), lambda i: (i, 0)),       # x tile (pipelined)
            pl.BlockSpec((IN_DIM, HID_DIM), lambda i: (0, 0)),  # w1 (VMEM-resident)
            pl.BlockSpec((1, HID_DIM), lambda i: (0, 0)),       # b1
            pl.BlockSpec((1, HID_DIM), lambda i: (0, 0)),       # w2 (row vector)
            pl.BlockSpec((1, OUT_DIM), lambda i: (0, 0)),       # b2
        ],
        out_specs=pl.BlockSpec((tb, OUT_DIM), lambda i: (i, 0)),
        compiler_params=pltpu.CompilerParams(
            # Batch tiles are independent -> shard across TensorCores on v7x.
            dimension_semantics=("parallel",),
        ),
    )(x_bf16, w1_bf16, b1, w2, b2)
    return out[:B]


def init_params(key):
    # Deterministic init mimicking nn.Linear's U(-1/sqrt(fan_in), 1/sqrt(fan_in)).
    k1, k2, k3, k4 = jax.random.split(key, 4)
    lim1 = 1.0 / (IN_DIM ** 0.5)
    lim2 = 1.0 / (HID_DIM ** 0.5)
    w1 = jax.random.uniform(k1, (IN_DIM, HID_DIM), jnp.float32, -lim1, lim1)  # (in, out)
    b1 = jax.random.uniform(k2, (1, HID_DIM), jnp.float32, -lim1, lim1)
    w2 = jax.random.uniform(k3, (1, HID_DIM), jnp.float32, -lim2, lim2)       # fc2 row
    b2 = jax.random.uniform(k4, (1, OUT_DIM), jnp.float32, -lim2, lim2)
    return w1, b1, w2, b2


def reference_forward_f32(x, w1, b1, w2, b2):
    h = jnp.dot(x, w1, precision=jax.lax.Precision.HIGHEST) + b1
    h = jnp.where(h > 0, h, 0.2 * h)
    return jnp.sum(h * w2, axis=-1, keepdims=True) + b2


def reference_forward_bf16_inputs(x, w1, b1, w2, b2):
    # Same math but with the same bf16 quantization of the fc1 operands as the kernel.
    xq = x.astype(jnp.bfloat16).astype(jnp.float32)
    wq = w1.astype(jnp.bfloat16).astype(jnp.float32)
    h = jnp.dot(xq, wq, precision=jax.lax.Precision.HIGHEST) + b1
    h = jnp.where(h > 0, h, 0.2 * h)
    return jnp.sum(h * w2, axis=-1, keepdims=True) + b2


if __name__ == "__main__":
    key = jax.random.PRNGKey(0)
    kx, kx2, kp = jax.random.split(key, 3)
    w1, b1, w2, b2 = init_params(kp)

    # Case 1: small single-tile batch (B=8). At this size Pallas is pure launch
    # overhead -- it is a correctness check, not a benchmark shape.
    B = 8
    x = jax.random.normal(kx, (B, IN_DIM), jnp.float32)
    out = jax.block_until_ready(discriminator_forward(x, w1, b1, w2, b2))
    assert out.shape == (B, OUT_DIM)
    assert jnp.allclose(out, reference_forward_bf16_inputs(x, w1, b1, w2, b2),
                        atol=1e-4, rtol=1e-4)
    assert jnp.allclose(out, reference_forward_f32(x, w1, b1, w2, b2),
                        atol=3e-2, rtol=3e-2)  # looser: bf16 fc1 operand stream

    # Case 2: multi-tile batch with a padded tail (exercises the batch grid).
    B2 = 20
    x2 = jax.random.normal(kx2, (B2, IN_DIM), jnp.float32)
    out2 = jax.block_until_ready(discriminator_forward(x2, w1, b1, w2, b2, tb=8))
    assert out2.shape == (B2, OUT_DIM)
    assert jnp.allclose(out2, reference_forward_bf16_inputs(x2, w1, b1, w2, b2),
                        atol=1e-4, rtol=1e-4)

    print("KERNEL_OK")
</pallas_src>

<mosaic_0001>
module attributes {stable_mosaic.version = 11 : i64} {
  func.func @discriminator_kernel(%arg0: i32, %arg1: memref<8x512xbf16, #tpu.memory_space<vmem>>, %arg2: memref<512x128xbf16, #tpu.memory_space<vmem>>, %arg3: memref<1x128xf32, #tpu.memory_space<vmem>>, %arg4: memref<1x128xf32, #tpu.memory_space<vmem>>, %arg5: memref<1x1xf32, #tpu.memory_space<vmem>>, %arg6: memref<8x1xf32, #tpu.memory_space<vmem>>) attributes {dimension_semantics = [#tpu.dimension_semantics<parallel>], iteration_bounds = array<i64: 1>, scalar_prefetch = 0 : i64, scratch_operands = 0 : i64, tpu.core_type = #tpu.core_type<tc>, window_params = [{transform_indices = @transform_0, window_bounds = array<i64: 8, 512>}, {pipeline_mode = #tpu.pipeline_mode<synchronous>, transform_indices = @transform_1, window_bounds = array<i64: 512, 128>}, {pipeline_mode = #tpu.pipeline_mode<synchronous>, transform_indices = @transform_2, window_bounds = array<i64: 1, 128>}, {pipeline_mode = #tpu.pipeline_mode<synchronous>, transform_indices = @transform_3, window_bounds = array<i64: 1, 128>}, {pipeline_mode = #tpu.pipeline_mode<synchronous>, transform_indices = @transform_4, window_bounds = array<i64: 1, 1>}, {transform_indices = @transform_5, window_bounds = array<i64: 8, 1>}]} {
    %c0 = arith.constant 0 : index
    %c0_0 = arith.constant 0 : index
    %0 = vector.load %arg1[%c0, %c0_0] : memref<8x512xbf16, #tpu.memory_space<vmem>>, vector<8x512xbf16>
    %c0_1 = arith.constant 0 : index
    %c0_2 = arith.constant 0 : index
    %1 = vector.load %arg2[%c0_1, %c0_2] : memref<512x128xbf16, #tpu.memory_space<vmem>>, vector<512x128xbf16>
    %cst = arith.constant dense<0.000000e+00> : vector<8x128xf32>
    %2 = tpu.matmul %0, %1, %cst {dimension_numbers = #tpu.dot_dimension_numbers<[1], [0], [0], [1], [0, 0, 1, 1], [], []>} : vector<8x512xbf16>, vector<512x128xbf16>, vector<8x128xf32> -> vector<8x128xf32>
    %c0_3 = arith.constant 0 : index
    %c0_4 = arith.constant 0 : index
    %3 = vector.load %arg3[%c0_3, %c0_4] : memref<1x128xf32, #tpu.memory_space<vmem>>, vector<1x128xf32>
    %4 = vector.broadcast %3 : vector<1x128xf32> to vector<8x128xf32>
    %5 = arith.addf %2, %4 : vector<8x128xf32>
    %cst_5 = arith.constant 0.000000e+00 : f32
    %6 = vector.broadcast %cst_5 : f32 to vector<8x128xf32>
    %7 = arith.cmpf ogt, %5, %6 : vector<8x128xf32>
    %cst_6 = arith.constant 2.000000e-01 : f32
    %8 = vector.broadcast %cst_6 : f32 to vector<8x128xf32>
    %9 = arith.mulf %8, %5 : vector<8x128xf32>
    %10 = arith.select %7, %5, %9 : vector<8x128xi1>, vector<8x128xf32>
    %c0_7 = arith.constant 0 : index
    %c0_8 = arith.constant 0 : index
    %11 = vector.load %arg4[%c0_7, %c0_8] : memref<1x128xf32, #tpu.memory_space<vmem>>, vector<1x128xf32>
    %12 = vector.broadcast %11 : vector<1x128xf32> to vector<8x128xf32>
    %13 = arith.mulf %10, %12 : vector<8x128xf32>
    %cst_9 = arith.constant dense<0.000000e+00> : vector<8xf32>
    %14 = vector.multi_reduction <add>, %13, %cst_9 [1] : vector<8x128xf32> to vector<8xf32>
    %15 = vector.shape_cast %14 : vector<8xf32> to vector<8x1xf32>
    %c0_10 = arith.constant 0 : index
    %c0_11 = arith.constant 0 : index
    %16 = vector.load %arg5[%c0_10, %c0_11] : memref<1x1xf32, #tpu.memory_space<vmem>>, vector<1x1xf32>
    %17 = vector.broadcast %16 : vector<1x1xf32> to vector<8x1xf32>
    %18 = arith.addf %15, %17 : vector<8x1xf32>
    %c0_12 = arith.constant 0 : index
    %c0_13 = arith.constant 0 : index
    %19 = vector.load %arg6[%c0_12, %c0_13] : memref<8x1xf32, #tpu.memory_space<vmem>>, vector<8x1xf32>
    tpu.vector_store %arg6[%c0_12, %c0_13], %18 {strides = array<i32>} : memref<8x1xf32, #tpu.memory_space<vmem>>, vector<8x1xf32>,
    return
  }
  func.func @transform_0(%arg0: i32) -> (i32, i32) {
    %c0_i32 = arith.constant 0 : i32
    %c0_i32_0 = arith.constant 0 : i32
    return %arg0, %c0_i32 : i32, i32
  }
  func.func @transform_1(%arg0: i32) -> (i32, i32) {
    %c0_i32 = arith.constant 0 : i32
    %c0_i32_0 = arith.constant 0 : i32
    %c0_i32_1 = arith.constant 0 : i32
    return %c0_i32, %c0_i32_0 : i32, i32
  }
  func.func @transform_2(%arg0: i32) -> (i32, i32) {
    %c0_i32 = arith.constant 0 : i32
    %c0_i32_0 = arith.constant 0 : i32
    %c0_i32_1 = arith.constant 0 : i32
    return %c0_i32, %c0_i32_0 : i32, i32
  }
  func.func @transform_3(%arg0: i32) -> (i32, i32) {
    %c0_i32 = arith.constant 0 : i32
    %c0_i32_0 = arith.constant 0 : i32
    %c0_i32_1 = arith.constant 0 : i32
    return %c0_i32, %c0_i32_0 : i32, i32
  }
  func.func @transform_4(%arg0: i32) -> (i32, i32) {
    %c0_i32 = arith.constant 0 : i32
    %c0_i32_0 = arith.constant 0 : i32
    %c0_i32_1 = arith.constant 0 : i32
    return %c0_i32, %c0_i32_0 : i32, i32
  }
  func.func @transform_5(%arg0: i32) -> (i32, i32) {
    %c0_i32 = arith.constant 0 : i32
    %c0_i32_0 = arith.constant 0 : i32
    return %arg0, %c0_i32 : i32, i32
  }
}

</mosaic_0001>

<bundles_post_ra>
// kernel: tpu_custom_call.1
= control target key start
LH: loop header
LB: loop body
LE: loop exit
PB: predicated region body
PF: predicated region fallthrough
CT: control target
= control target key end

     0   :  { %s674_s0 = inlined_call_operand.hbm [shape: bf16[8,512], index: 0, kind: input, shape index: {}]   ;;  %s675_s1 = inlined_call_operand.hbm [shape: bf16[512,128], index: 1, kind: input, shape index: {}]   ;;  %s676_s2 = inlined_call_operand.vmem [shape: f32[1,128], index: 2, kind: input, shape index: {}]   ;;  %s677_s3 = inlined_call_operand.vmem [shape: f32[1,128], index: 3, kind: input, shape index: {}]   ;;  %s678_s4 = inlined_call_operand.<no memory space> [shape: f32[1,1], index: 4, kind: input, shape index: {}]   ;;  %s679_s5 = inlined_call_operand.vmem [shape: f32[8,1], index: 5, kind: output, shape index: {}]  }
   0x1   :  { %v10_v0 = vstv %s678_s4 }
   0x2   :  { %11 = vst [vmem:[#allocation2] sm:$0x1] %v10_v0 }
   0x3   :  { %12 = vsyncpa [#allocation4], 0  ;;  %s19_s22 = sshll.u32 %s674_s0, 4  ;;  %s20_s22 = int_to_ptr.hbm [resolvable:$true] %s19_s22 }
   0x4   :  { %13 = vsyncpa [#allocation6], 0  ;;  %s622_s23 = smov [#allocation3]   ;;  %s29_s27 = sshll.u32 %s675_s1, 4  ;;  %s30_s27 = int_to_ptr.hbm [resolvable:$true] %s29_s27 }
   0x5   :  { %s21_s24 = sshll.u32 %s622_s23, 4  ;;  %s623_s28 = smov [#allocation5]   ;;  %s22_s24 = int_to_ptr.vmem [resolvable:$true] %s21_s24 }
   0x6   :  { %24 = dma.hbm_to_vmem [thread:$0]  %s20_s22, 256, %s22_s24, [#allocation4]  }
   0x7   :  { %s31_s29 = sshll.u32 %s623_s28, 4  ;;  %s624_s4 = smov 64   ;;  %s32_s29 = int_to_ptr.vmem [resolvable:$true] %s31_s29 }
   0x8   :  { %s625_s30 = smov 4  }
   0x9   :  { %37 = dma.hbm_to_vmem [thread:$0]  %s30_s27, 4096, %s32_s29, [#allocation6], %s624_s4, %s624_s4, %s625_s30  }
   0xa   :  { %618 = dma.done.wait [#allocation4], 256  }
   0xb   :  { %619 = vsyncadd [#allocation4], 4294967040 }
   0xc   :  { %620 = dma.done.wait [#allocation6], 4096  }
   0xd   :  { %621 = vsyncadd [#allocation6], 4294963200  ;;  %v538_v1 = vld [vmem:[#allocation5 + $0x38] sm:$0xff]  ;;  %v537_v5 = vld [vmem:[#allocation5 + $0x30] sm:$0xff]  ;;  %vm395_vm1 = vcmask 7168  }
   0xe   :  { %v546_v2 = vld [vmem:[#allocation5 + $0x78] sm:$0xff]  ;;  %328 = vmatpush.bf16.msra.mxu0 %v538_v1  ;;  %v545_v6 = vld [vmem:[#allocation5 + $0x70] sm:$0xff]  ;;  %v536_v9 = vld [vmem:[#allocation5 + $0x28] sm:$0xff] }
   0xf   :  { %v554_v3 = vld [vmem:[#allocation5 + $0xb8] sm:$0xff]  ;;  %341 = vmatpush.bf16.msra.mxu1 %v546_v2  ;;  %v553_v7 = vld [vmem:[#allocation5 + $0xb0] sm:$0xff]  ;;  %v544_v10 = vld [vmem:[#allocation5 + $0x68] sm:$0xff] }
  0x10   :  { %v562_v4 = vld [vmem:[#allocation5 + $0xf8] sm:$0xff]  ;;  %354 = vmatpush.bf16.msra.mxu2 %v554_v3  ;;  %v561_v8 = vld [vmem:[#allocation5 + $0xf0] sm:$0xff]  ;;  %v552_v11 = vld [vmem:[#allocation5 + $0xa8] sm:$0xff] }
  0x11   :  { %367 = vmatpush.bf16.msra.mxu3 %v562_v4  ;;  %v560_v12 = vld [vmem:[#allocation5 + $0xe8] sm:$0xff]  ;;  %v535_v13 = vld [vmem:[#allocation5 + $0x20] sm:$0xff]  ;;  %v534_v17 = vld [vmem:[#allocation5 + $0x18] sm:$0xff] }
  0x12   :  { %329 = vmatpush.bf16.msra.mxu0 %v537_v5  ;;  %v543_v14 = vld [vmem:[#allocation5 + $0x60] sm:$0xff]  ;;  %v542_v18 = vld [vmem:[#allocation5 + $0x58] sm:$0xff]  ;;  %v533_v21 = vld [vmem:[#allocation5 + $0x10] sm:$0xff] }
  0x13   :  { %342 = vmatpush.bf16.msra.mxu1 %v545_v6  ;;  %v551_v15 = vld [vmem:[#allocation5 + $0xa0] sm:$0xff]  ;;  %v550_v19 = vld [vmem:[#allocation5 + $0x98] sm:$0xff]  ;;  %v541_v22 = vld [vmem:[#allocation5 + $0x50] sm:$0xff] }
  0x14   :  { %355 = vmatpush.bf16.msra.mxu2 %v553_v7  ;;  %v559_v16 = vld [vmem:[#allocation5 + $0xe0] sm:$0xff]  ;;  %v558_v20 = vld [vmem:[#allocation5 + $0xd8] sm:$0xff]  ;;  %v549_v23 = vld [vmem:[#allocation5 + $0x90] sm:$0xff] }
  0x15   :  { %368 = vmatpush.bf16.msra.mxu3 %v561_v8  ;;  %v557_v24 = vld [vmem:[#allocation5 + $0xd0] sm:$0xff]  ;;  %v532_v25 = vld [vmem:[#allocation5 + $0x8] sm:$0xff]  ;;  %v53_v30 = vld [vmem:[#allocation3 + $0x8] sm:$0xff] }
  0x16   :  { %330 = vmatpush.bf16.msra.mxu0 %v536_v9  ;;  %v540_v26 = vld [vmem:[#allocation5 + $0x48] sm:$0xff]  ;;  %v52_v27 = vld [vmem:[#allocation3] sm:$0xff]  ;;  %v531_v33 = vld [vmem:[#allocation5] sm:$0xff]  ;;  %v126_v35 = vunpack.c.l.b16 %v53_v30  ;;  %v127_v36 = vunpack.c.h.b16 %v53_v30 }
  0x17   :  { %343 = vmatpush.bf16.msra.mxu1 %v544_v10  ;;  %v548_v28 = vld [vmem:[#allocation5 + $0x88] sm:$0xff]  ;;  %v124_v31 = vunpack.c.l.b16 %v52_v27  ;;  %v125_v32 = vunpack.c.h.b16 %v52_v27  ;;  %v539_v34 = vld [vmem:[#allocation5 + $0x40] sm:$0xff] }
  0x18   :  { %356 = vmatpush.bf16.msra.mxu2 %v552_v11  ;;  %v556_v29 = vld [vmem:[#allocation5 + $0xc8] sm:$0xff]  ;;  %v547_v37 = vld [vmem:[#allocation5 + $0x80] sm:$0xff]  ;;  %v130_v41 = vpack.c.b16 %v126_v35, %v126_v35  ;;  %v131_v42 = vpack.c.b16 %v127_v36, %v127_v36 }
  0x19   :  { %369 = vmatpush.bf16.msra.mxu3 %v560_v12  ;;  %v555_v38 = vld [vmem:[#allocation5 + $0xc0] sm:$0xff]  ;;  %v128_v39 = vpack.c.b16 %v124_v31, %v124_v31  ;;  %v129_v40 = vpack.c.b16 %v125_v32, %v125_v32  ;;  %v567_v43 = vld [vmem:[%s676_s2] ss:$0 sm:$0xff] }
  0x1a   :  { %331 = vmatpush.bf16.msra.mxu0 %v535_v13  ;;  %v568_v54 = vld [vmem:[%s677_s3] ss:$0 sm:$0xff] }
  0x1b   :  { %344 = vmatpush.bf16.msra.mxu1 %v543_v14  ;;  %v569_v60 = vld [vmem:[#allocation2] ss:$0 sm:$0xff] }
  0x1c   :  { %357 = vmatpush.bf16.msra.mxu2 %v551_v15 }
  0x1d   :  { %370 = vmatpush.bf16.msra.mxu3 %v559_v16 }
  0x1e   :  { %332 = vmatpush.bf16.msra.mxu0 %v534_v17 }
  0x1f   :  { %345 = vmatpush.bf16.msra.mxu1 %v542_v18 }
  0x20   :  { %358 = vmatpush.bf16.msra.mxu2 %v550_v19 }
  0x21   :  { %371 = vmatpush.bf16.msra.mxu3 %v558_v20 }
  0x22   :  { %333 = vmatpush.bf16.msra.mxu0 %v533_v21 }
  0x23   :  { %346 = vmatpush.bf16.msra.mxu1 %v541_v22 }
  0x24   :  { %359 = vmatpush.bf16.msra.mxu2 %v549_v23 }
  0x25   :  { %372 = vmatpush.bf16.msra.mxu3 %v557_v24 }
  0x26   :  { %334 = vmatpush.bf16.msra.mxu0 %v532_v25 }
  0x27   :  { %347 = vmatpush.bf16.msra.mxu1 %v540_v26 }
  0x28   :  { %360 = vmatpush.bf16.msra.mxu2 %v548_v28 }
  0x29   :  { %373 = vmatpush.bf16.msra.mxu3 %v556_v29 }
  0x2a   :  { %335 = vmatpush.bf16.msra.mxu0 %v531_v33 }
  0x2b   :  { %348 = vmatpush.bf16.msra.mxu1 %v539_v34 }
  0x2c   :  { %361 = vmatpush.bf16.msra.mxu2 %v547_v37 }
  0x2d   :  { %374 = vmatpush.bf16.msra.mxu3 %v555_v38  ;;  %336 = vmatmul.bf16.vlgmr.msra.gmra.mxu0 %v128_v39 }
  0x2e   :  { %349 = vmatmul.bf16.vlgmr.msra.gmra.mxu1 %v129_v40 }
  0x2f   :  { %362 = vmatmul.bf16.vlgmr.msra.gmra.mxu2 %v130_v41 }
  0x30   :  { %375 = vmatmul.bf16.vlgmr.msra.gmra.mxu3 %v131_v42 }
  0xaa   :  { %v337_v44 = vpop.f32.mrf.mxu0 }
  0xab   :  { %v350_v45 = vpop.f32.mrf.mxu1  ;;  %v338_v46 = vadd.f32 %v567_v43, %v337_v44 }
  0xad   :  { %v351_v47 = vadd.f32 %v350_v45, %v338_v46 }
  0xb2   :  { %v363_v48 = vpop.f32.mrf.mxu2  ;;  %v339_v51 = vpop.f32.mrf.mxu0 }
  0xb3   :  { %v376_v49 = vpop.f32.mrf.mxu3  ;;  %v364_v50 = vadd.f32 %v363_v48, %v351_v47  ;;  %v352_v52 = vpop.f32.mrf.mxu1 }
  0xb5   :  { %v377_v53 = vadd.f32 %v376_v49, %v364_v50 }
  0xb7   :  { %v381_v55 = vmul.f32 0.2, %v377_v53  ;;  %vm380_vm0 = vcmp.gt.f32.partialorder %v377_v53, 0.0 }
  0xb9   :  { %v382_v56 = vsel %vm380_vm0, %v377_v53, %v381_v55 }
  0xba   :  { %v365_v57 = vpop.f32.mrf.mxu2  ;;  %v387_v59 = vmul.f32 %v568_v54, %v382_v56 }
  0xbb   :  { %v378_v58 = vpop.f32.mrf.mxu3 }
  0xbc   :  { %388 = vadd.xlane.f32.xlu0 %v387_v59 }
 0x12f   :  { %v389_v61 = vpop.xlane.xlu0 %388 }
 0x130   :  { %v394_v62 = vadd.f32 %v569_v60, %v389_v61 }
 0x132   :  { %396 = vst.msk [vmem:[%s679_s5] sm:$0xff] %vm395_vm1, %v394_v62 }
 0x133   :  { %401 = vsyncpa [#allocation4], 1 }
 0x134   :  { %402 = vsyncpa [#allocation6], 1 }

</bundles_post_ra>
